<compile_context>
chip_gen: v6e
topology: v6e:2x2x1
jax: 0.10.0
libtpu: 0.0.40
codegen_flags: <defaults>
</compile_context>

<pallas_src>
import functools

import jax
import jax.numpy as jnp
from jax.experimental import pallas as pl
from jax.experimental.pallas import tpu as pltpu

NUM_SUB_TRAJ = 70                      # num_sub_traj_seek in the reference
INPUT_SIZE = 4                         # nn.RNN(4, 2)
HIDDEN_SIZE = 2
FEAT_SIZE = 5
HEAD_DIM = 4 * NUM_SUB_TRAJ + FEAT_SIZE   # 285
NUM_STREAMS = 4                        # [train_seek, test_seek, train_serv, test_serv]


# ----------------------------- fused Pallas kernel ---------------------------

def net_kernel(rnn_w_ref, fc2_w_ref, x_ref, feat_ref, out_ref):
    """Fully fused Net.forward (single recurrence over 4 sublane-stacked streams).

    rnn_w_ref : VMEM (4B, 14)  per-sublane RNN params; rows 0..2B-1 carry the
                seek RNN's values, rows 2B..4B-1 the service RNN's.  Columns =
                [W_ih[0,0..3], W_ih[1,0..3], W_hh[0,0], W_hh[0,1], W_hh[1,0],
                 W_hh[1,1], b_ih[0]+b_hh[0], b_ih[1]+b_hh[1]].
    fc2_w_ref : VMEM (8, 70)   fc2 weight split by hidden-unit parity:
                rows = [seek_h0, seek_h1, serv_h0, serv_h1, feat(pad to 70),
                        bias at [5,0], 0, 0] — reproduces the reference concat
                order without materializing a 285-wide concat.
    x_ref     : VMEM (T*4, 4B, 70)  (time, input-dim) on the untiled leading
                axis; (stream, batch) stacked on sublanes; 70 sub-traj lanes.
    feat_ref  : VMEM (2B, 5)   rows 0..B-1 = train features, B..2B-1 = test.
    out_ref   : VMEM (B, 1)    = 1 - sigmoid(fc2(|train_vec - test_vec|)).
    """
    ti, rows, c = x_ref.shape
    t_steps = ti // INPUT_SIZE
    b = rows // NUM_STREAMS

    wmat = rnn_w_ref[...]                                   # (4B, 14)

    # Hoist the per-sublane weight columns and lane-broadcast them ONCE
    # (JAX does not CSE broadcast_in_dim inside the unrolled loop).
    def col(k):
        return jnp.broadcast_to(wmat[:, k:k + 1], (rows, c))

    wi0 = [col(k) for k in range(0, INPUT_SIZE)]            # -> hidden unit 0
    wi1 = [col(k) for k in range(INPUT_SIZE, 2 * INPUT_SIZE)]
    u00, u01 = col(8), col(9)
    u10, u11 = col(10), col(11)
    b0, b1 = col(12), col(13)

    h0 = jnp.zeros((rows, c), jnp.float32)
    h1 = jnp.zeros((rows, c), jnp.float32)
    for t in range(t_steps):                 # static -> fully unrolled (T=6)
        pre0 = b0 + u00 * h0 + u01 * h1
        pre1 = b1 + u10 * h0 + u11 * h1
        for i in range(INPUT_SIZE):          # static -> fully unrolled (I=4)
            x_ti = x_ref[t * INPUT_SIZE + i]                 # (4B, 70) slab
            pre0 = pre0 + wi0[i] * x_ti
            pre1 = pre1 + wi1[i] * x_ti
        h0 = jnp.tanh(pre0)                  # EUP, full-occupancy vregs
        h1 = jnp.tanh(pre1)

    # Head: z = w . |train_vec - test_vec| + bias, computed piecewise
    # (VPU mul + lane reduction), exact reference concat order.
    w = fc2_w_ref[...]                                        # (8, 70)
    d_s0 = jnp.abs(h0[0:b] - h0[b:2 * b])                     # seek h0 diff (B,70)
    d_s1 = jnp.abs(h1[0:b] - h1[b:2 * b])                     # seek h1 diff
    d_v0 = jnp.abs(h0[2 * b:3 * b] - h0[3 * b:4 * b])         # service h0 diff
    d_v1 = jnp.abs(h1[2 * b:3 * b] - h1[3 * b:4 * b])         # service h1 diff
    acc = (d_s0 * w[0:1, :] + d_s1 * w[1:2, :]
           + d_v0 * w[2:3, :] + d_v1 * w[3:4, :])             # (B, 70)
    z = jnp.sum(acc, axis=1, keepdims=True)                   # (B, 1)

    feat = feat_ref[...]                                      # (2B, 5)
    d_f = jnp.abs(feat[0:b] - feat[b:2 * b]) * w[4:5, 0:FEAT_SIZE]
    z = z + jnp.sum(d_f, axis=1, keepdims=True) + w[5:6, 0:1]   # + fc2 bias

    # 1 - sigmoid(z) == sigmoid(-z) == 1 / (1 + exp(z))  (numerically robust)
    out_ref[...] = 1.0 / (1.0 + jnp.exp(z))


# ------------------------------ wrappers --------------------------------------

def prepare_params(params, batch_size):
    """One-time packing of the tiny parameters into kernel-friendly arrays."""
    B = batch_size

    def rnn_row(p):
        bias = p["bih"] + p["bhh"]
        return jnp.concatenate(
            [p["wih"][0], p["wih"][1], p["whh"][0], p["whh"][1], bias]
        ).reshape(1, 14).astype(jnp.float32)

    seek_row = rnn_row(params["seek"])
    serv_row = rnn_row(params["service"])
    # Sublane rows: [tr_seek x B, te_seek x B, tr_serv x B, te_serv x B]
    rnn_w = jnp.concatenate([jnp.tile(seek_row, (2 * B, 1)),
                             jnp.tile(serv_row, (2 * B, 1))], axis=0)  # (4B, 14)

    w = params["fc2"]["w"].reshape(HEAD_DIM).astype(jnp.float32)       # (285,)
    c2 = 2 * NUM_SUB_TRAJ
    zero = jnp.zeros((NUM_SUB_TRAJ,), jnp.float32)
    w_feat = zero.at[:FEAT_SIZE].set(w[2 * c2:])
    w_bias = zero.at[0].set(params["fc2"]["b"].reshape(()).astype(jnp.float32))
    fc2_w = jnp.stack(
        [w[0:c2:2],                # multiplies seek h0 of subtraj c
         w[1:c2:2],                # multiplies seek h1
         w[c2:2 * c2:2],           # multiplies service h0
         w[c2 + 1:2 * c2:2],       # multiplies service h1
         w_feat, w_bias, zero, zero], axis=0)                           # (8, 70)

    return {"rnn_w": rnn_w, "fc2_w": fc2_w}


def net_forward(kernel_params, train_seek, train_service, train_features,
                test_seek, test_service, test_features):
    """Inputs: *_seek / *_service : (B, 70, T, 4) f32; *_features : (B, 5) f32.
    Returns (B,) f32 -- identical semantics to Net.forward."""
    B, C, T, I = train_seek.shape

    # Single wrapper-side layout op: stack the 4 streams, put (time, input) on
    # the untiled leading axis and (stream, batch) on the sublanes.
    x = jnp.stack([train_seek, test_seek, train_service, test_service], axis=0)
    x = jnp.transpose(x, (3, 4, 0, 1, 2)).reshape(T * I, NUM_STREAMS * B, C)

    feat = jnp.concatenate([train_features, test_features], axis=0)     # (2B, 5)

    vmem = pl.BlockSpec(memory_space=pltpu.MemorySpace.VMEM)

    out = pl.pallas_call(
        net_kernel,
        out_shape=jax.ShapeDtypeStruct((B, 1), jnp.float32),
        in_specs=[vmem, vmem, vmem, vmem],
        out_specs=vmem,
    )(kernel_params["rnn_w"], kernel_params["fc2_w"], x, feat)
    return out.reshape(-1)


# ------------------------------ pure-JAX reference ----------------------------

def net_forward_reference(params, train_seek, train_service, train_features,
                          test_seek, test_service, test_features):
    def rnn(p, x):
        B, C, T, I = x.shape
        xf = x.reshape(B * C, T, I)
        h = jnp.zeros((B * C, HIDDEN_SIZE), jnp.float32)
        for t in range(T):
            h = jnp.tanh(xf[:, t, :] @ p["wih"].T + h @ p["whh"].T
                         + p["bih"] + p["bhh"])
        return h.reshape(B, C * HIDDEN_SIZE)     # [c0_h0, c0_h1, c1_h0, ...]

    tr = jnp.concatenate([rnn(params["seek"], train_seek),
                          rnn(params["service"], train_service),
                          train_features], axis=1)
    te = jnp.concatenate([rnn(params["seek"], test_seek),
                          rnn(params["service"], test_service),
                          test_features], axis=1)
    z = jnp.abs(tr - te) @ params["fc2"]["w"].T + params["fc2"]["b"]
    return (1.0 - jax.nn.sigmoid(z)).reshape(-1)


# ------------------------------ params ----------------------------------------

def init_params(key):
    ks = jax.random.split(key, 10)
    srnn = 1.0 / jnp.sqrt(jnp.float32(HIDDEN_SIZE))
    sfc = 1.0 / jnp.sqrt(jnp.float32(HEAD_DIM))

    def u(k, shape, bound):
        return jax.random.uniform(k, shape, jnp.float32, -bound, bound)

    return {
        "seek": {
            "wih": u(ks[0], (HIDDEN_SIZE, INPUT_SIZE), srnn),
            "whh": u(ks[1], (HIDDEN_SIZE, HIDDEN_SIZE), srnn),
            "bih": u(ks[2], (HIDDEN_SIZE,), srnn),
            "bhh": u(ks[3], (HIDDEN_SIZE,), srnn),
        },
        "service": {
            "wih": u(ks[4], (HIDDEN_SIZE, INPUT_SIZE), srnn),
            "whh": u(ks[5], (HIDDEN_SIZE, HIDDEN_SIZE), srnn),
            "bih": u(ks[6], (HIDDEN_SIZE,), srnn),
            "bhh": u(ks[7], (HIDDEN_SIZE,), srnn),
        },
        "fc2": {
            "w": u(ks[8], (1, HEAD_DIM), sfc),
            "b": u(ks[9], (1,), sfc),
        },
    }


# ------------------------------ main -------------------------------------------

if __name__ == "__main__":
    key = jax.random.PRNGKey(0)
    kparam, k1, k2, k3, k4, k5, k6 = jax.random.split(key, 7)

    params = init_params(kparam)

    B, T = 2, 6   # small batch / short sub-trajectory length
    seq_shape = (B, NUM_SUB_TRAJ, T, INPUT_SIZE)
    train_seek = jax.random.normal(k1, seq_shape, jnp.float32)
    train_service = jax.random.normal(k2, seq_shape, jnp.float32)
    train_features = jax.random.normal(k3, (B, FEAT_SIZE), jnp.float32)
    test_seek = jax.random.normal(k4, seq_shape, jnp.float32)
    test_service = jax.random.normal(k5, seq_shape, jnp.float32)
    test_features = jax.random.normal(k6, (B, FEAT_SIZE), jnp.float32)

    kernel_params = prepare_params(params, B)   # one-time, outside jit
    fwd = jax.jit(functools.partial(net_forward, kernel_params))

    out = fwd(train_seek, train_service, train_features,
              test_seek, test_service, test_features)
    out = jax.block_until_ready(out)

    assert out.shape == (B,), out.shape
    assert bool(jnp.all(jnp.isfinite(out)))

    ref = net_forward_reference(params, train_seek, train_service, train_features,
                                test_seek, test_service, test_features)
    assert bool(jnp.allclose(out, ref, atol=1e-4, rtol=1e-4)), (out, ref)

    print("KERNEL_OK")
</pallas_src>

<mosaic_0001>
module attributes {stable_mosaic.version = 11 : i64} {
  func.func @net_kernel(%arg0: memref<8x14xf32, #tpu.memory_space<vmem>>, %arg1: memref<8x70xf32, #tpu.memory_space<vmem>>, %arg2: memref<24x8x70xf32, #tpu.memory_space<vmem>>, %arg3: memref<4x5xf32, #tpu.memory_space<vmem>>, %arg4: memref<2x1xf32, #tpu.memory_space<vmem>>) attributes {dimension_semantics = [], scalar_prefetch = 0 : i64, scratch_operands = 0 : i64, tpu.core_type = #tpu.core_type<tc>} {
    %c0 = arith.constant 0 : index
    %c0_0 = arith.constant 0 : index
    %0 = vector.load %arg0[%c0, %c0_0] : memref<8x14xf32, #tpu.memory_space<vmem>>, vector<8x14xf32>
    %1 = vector.extract_strided_slice %0 {offsets = [0, 0], sizes = [8, 1], strides = [1, 1]} : vector<8x14xf32> to vector<8x1xf32>
    %2 = vector.shape_cast %1 : vector<8x1xf32> to vector<8x1xf32>
    %3 = vector.broadcast %2 : vector<8x1xf32> to vector<8x70xf32>
    %4 = vector.extract_strided_slice %0 {offsets = [0, 1], sizes = [8, 1], strides = [1, 1]} : vector<8x14xf32> to vector<8x1xf32>
    %5 = vector.shape_cast %4 : vector<8x1xf32> to vector<8x1xf32>
    %6 = vector.broadcast %5 : vector<8x1xf32> to vector<8x70xf32>
    %7 = vector.extract_strided_slice %0 {offsets = [0, 2], sizes = [8, 1], strides = [1, 1]} : vector<8x14xf32> to vector<8x1xf32>
    %8 = vector.shape_cast %7 : vector<8x1xf32> to vector<8x1xf32>
    %9 = vector.broadcast %8 : vector<8x1xf32> to vector<8x70xf32>
    %10 = vector.extract_strided_slice %0 {offsets = [0, 3], sizes = [8, 1], strides = [1, 1]} : vector<8x14xf32> to vector<8x1xf32>
    %11 = vector.shape_cast %10 : vector<8x1xf32> to vector<8x1xf32>
    %12 = vector.broadcast %11 : vector<8x1xf32> to vector<8x70xf32>
    %13 = vector.extract_strided_slice %0 {offsets = [0, 4], sizes = [8, 1], strides = [1, 1]} : vector<8x14xf32> to vector<8x1xf32>
    %14 = vector.shape_cast %13 : vector<8x1xf32> to vector<8x1xf32>
    %15 = vector.broadcast %14 : vector<8x1xf32> to vector<8x70xf32>
    %16 = vector.extract_strided_slice %0 {offsets = [0, 5], sizes = [8, 1], strides = [1, 1]} : vector<8x14xf32> to vector<8x1xf32>
    %17 = vector.shape_cast %16 : vector<8x1xf32> to vector<8x1xf32>
    %18 = vector.broadcast %17 : vector<8x1xf32> to vector<8x70xf32>
    %19 = vector.extract_strided_slice %0 {offsets = [0, 6], sizes = [8, 1], strides = [1, 1]} : vector<8x14xf32> to vector<8x1xf32>
    %20 = vector.shape_cast %19 : vector<8x1xf32> to vector<8x1xf32>
    %21 = vector.broadcast %20 : vector<8x1xf32> to vector<8x70xf32>
    %22 = vector.extract_strided_slice %0 {offsets = [0, 7], sizes = [8, 1], strides = [1, 1]} : vector<8x14xf32> to vector<8x1xf32>
    %23 = vector.shape_cast %22 : vector<8x1xf32> to vector<8x1xf32>
    %24 = vector.broadcast %23 : vector<8x1xf32> to vector<8x70xf32>
    %25 = vector.extract_strided_slice %0 {offsets = [0, 8], sizes = [8, 1], strides = [1, 1]} : vector<8x14xf32> to vector<8x1xf32>
    %26 = vector.shape_cast %25 : vector<8x1xf32> to vector<8x1xf32>
    %27 = vector.broadcast %26 : vector<8x1xf32> to vector<8x70xf32>
    %28 = vector.extract_strided_slice %0 {offsets = [0, 9], sizes = [8, 1], strides = [1, 1]} : vector<8x14xf32> to vector<8x1xf32>
    %29 = vector.shape_cast %28 : vector<8x1xf32> to vector<8x1xf32>
    %30 = vector.broadcast %29 : vector<8x1xf32> to vector<8x70xf32>
    %31 = vector.extract_strided_slice %0 {offsets = [0, 10], sizes = [8, 1], strides = [1, 1]} : vector<8x14xf32> to vector<8x1xf32>
    %32 = vector.shape_cast %31 : vector<8x1xf32> to vector<8x1xf32>
    %33 = vector.broadcast %32 : vector<8x1xf32> to vector<8x70xf32>
    %34 = vector.extract_strided_slice %0 {offsets = [0, 11], sizes = [8, 1], strides = [1, 1]} : vector<8x14xf32> to vector<8x1xf32>
    %35 = vector.shape_cast %34 : vector<8x1xf32> to vector<8x1xf32>
    %36 = vector.broadcast %35 : vector<8x1xf32> to vector<8x70xf32>
    %37 = vector.extract_strided_slice %0 {offsets = [0, 12], sizes = [8, 1], strides = [1, 1]} : vector<8x14xf32> to vector<8x1xf32>
    %38 = vector.shape_cast %37 : vector<8x1xf32> to vector<8x1xf32>
    %39 = vector.broadcast %38 : vector<8x1xf32> to vector<8x70xf32>
    %40 = vector.extract_strided_slice %0 {offsets = [0, 13], sizes = [8, 1], strides = [1, 1]} : vector<8x14xf32> to vector<8x1xf32>
    %41 = vector.shape_cast %40 : vector<8x1xf32> to vector<8x1xf32>
    %42 = vector.broadcast %41 : vector<8x1xf32> to vector<8x70xf32>
    %cst = arith.constant 0.000000e+00 : f32
    %43 = vector.broadcast %cst : f32 to vector<8x70xf32>
    %cst_1 = arith.constant 0.000000e+00 : f32
    %44 = vector.broadcast %cst_1 : f32 to vector<8x70xf32>
    %45 = arith.mulf %27, %43 : vector<8x70xf32>
    %46 = arith.addf %39, %45 : vector<8x70xf32>
    %47 = arith.mulf %30, %44 : vector<8x70xf32>
    %48 = arith.addf %46, %47 : vector<8x70xf32>
    %49 = arith.mulf %33, %43 : vector<8x70xf32>
    %50 = arith.addf %42, %49 : vector<8x70xf32>
    %51 = arith.mulf %36, %44 : vector<8x70xf32>
    %52 = arith.addf %50, %51 : vector<8x70xf32>
    %c0_2 = arith.constant 0 : index
    %c0_3 = arith.constant 0 : index
    %c0_4 = arith.constant 0 : index
    %53 = vector.load %arg2[%c0_2, %c0_3, %c0_4] : memref<24x8x70xf32, #tpu.memory_space<vmem>>, vector<1x8x70xf32>
    %54 = vector.shape_cast %53 : vector<1x8x70xf32> to vector<8x70xf32>
    %55 = arith.mulf %3, %54 : vector<8x70xf32>
    %56 = arith.addf %48, %55 : vector<8x70xf32>
    %57 = arith.mulf %15, %54 : vector<8x70xf32>
    %58 = arith.addf %52, %57 : vector<8x70xf32>
    %c1 = arith.constant 1 : index
    %c0_5 = arith.constant 0 : index
    %c0_6 = arith.constant 0 : index
    %59 = vector.load %arg2[%c1, %c0_5, %c0_6] : memref<24x8x70xf32, #tpu.memory_space<vmem>>, vector<1x8x70xf32>
    %60 = vector.shape_cast %59 : vector<1x8x70xf32> to vector<8x70xf32>
    %61 = arith.mulf %6, %60 : vector<8x70xf32>
    %62 = arith.addf %56, %61 : vector<8x70xf32>
    %63 = arith.mulf %18, %60 : vector<8x70xf32>
    %64 = arith.addf %58, %63 : vector<8x70xf32>
    %c2 = arith.constant 2 : index
    %c0_7 = arith.constant 0 : index
    %c0_8 = arith.constant 0 : index
    %65 = vector.load %arg2[%c2, %c0_7, %c0_8] : memref<24x8x70xf32, #tpu.memory_space<vmem>>, vector<1x8x70xf32>
    %66 = vector.shape_cast %65 : vector<1x8x70xf32> to vector<8x70xf32>
    %67 = arith.mulf %9, %66 : vector<8x70xf32>
    %68 = arith.addf %62, %67 : vector<8x70xf32>
    %69 = arith.mulf %21, %66 : vector<8x70xf32>
    %70 = arith.addf %64, %69 : vector<8x70xf32>
    %c3 = arith.constant 3 : index
    %c0_9 = arith.constant 0 : index
    %c0_10 = arith.constant 0 : index
    %71 = vector.load %arg2[%c3, %c0_9, %c0_10] : memref<24x8x70xf32, #tpu.memory_space<vmem>>, vector<1x8x70xf32>
    %72 = vector.shape_cast %71 : vector<1x8x70xf32> to vector<8x70xf32>
    %73 = arith.mulf %12, %72 : vector<8x70xf32>
    %74 = arith.addf %68, %73 : vector<8x70xf32>
    %75 = arith.mulf %24, %72 : vector<8x70xf32>
    %76 = arith.addf %70, %75 : vector<8x70xf32>
    %77 = math.tanh %74 : vector<8x70xf32>
    %78 = math.tanh %76 : vector<8x70xf32>
    %79 = arith.mulf %27, %77 : vector<8x70xf32>
    %80 = arith.addf %39, %79 : vector<8x70xf32>
    %81 = arith.mulf %30, %78 : vector<8x70xf32>
    %82 = arith.addf %80, %81 : vector<8x70xf32>
    %83 = arith.mulf %33, %77 : vector<8x70xf32>
    %84 = arith.addf %42, %83 : vector<8x70xf32>
    %85 = arith.mulf %36, %78 : vector<8x70xf32>
    %86 = arith.addf %84, %85 : vector<8x70xf32>
    %c4 = arith.constant 4 : index
    %c0_11 = arith.constant 0 : index
    %c0_12 = arith.constant 0 : index
    %87 = vector.load %arg2[%c4, %c0_11, %c0_12] : memref<24x8x70xf32, #tpu.memory_space<vmem>>, vector<1x8x70xf32>
    %88 = vector.shape_cast %87 : vector<1x8x70xf32> to vector<8x70xf32>
    %89 = arith.mulf %3, %88 : vector<8x70xf32>
    %90 = arith.addf %82, %89 : vector<8x70xf32>
    %91 = arith.mulf %15, %88 : vector<8x70xf32>
    %92 = arith.addf %86, %91 : vector<8x70xf32>
    %c5 = arith.constant 5 : index
    %c0_13 = arith.constant 0 : index
    %c0_14 = arith.constant 0 : index
    %93 = vector.load %arg2[%c5, %c0_13, %c0_14] : memref<24x8x70xf32, #tpu.memory_space<vmem>>, vector<1x8x70xf32>
    %94 = vector.shape_cast %93 : vector<1x8x70xf32> to vector<8x70xf32>
    %95 = arith.mulf %6, %94 : vector<8x70xf32>
    %96 = arith.addf %90, %95 : vector<8x70xf32>
    %97 = arith.mulf %18, %94 : vector<8x70xf32>
    %98 = arith.addf %92, %97 : vector<8x70xf32>
    %c6 = arith.constant 6 : index
    %c0_15 = arith.constant 0 : index
    %c0_16 = arith.constant 0 : index
    %99 = vector.load %arg2[%c6, %c0_15, %c0_16] : memref<24x8x70xf32, #tpu.memory_space<vmem>>, vector<1x8x70xf32>
    %100 = vector.shape_cast %99 : vector<1x8x70xf32> to vector<8x70xf32>
    %101 = arith.mulf %9, %100 : vector<8x70xf32>
    %102 = arith.addf %96, %101 : vector<8x70xf32>
    %103 = arith.mulf %21, %100 : vector<8x70xf32>
    %104 = arith.addf %98, %103 : vector<8x70xf32>
    %c7 = arith.constant 7 : index
    %c0_17 = arith.constant 0 : index
    %c0_18 = arith.constant 0 : index
    %105 = vector.load %arg2[%c7, %c0_17, %c0_18] : memref<24x8x70xf32, #tpu.memory_space<vmem>>, vector<1x8x70xf32>
    %106 = vector.shape_cast %105 : vector<1x8x70xf32> to vector<8x70xf32>
    %107 = arith.mulf %12, %106 : vector<8x70xf32>
    %108 = arith.addf %102, %107 : vector<8x70xf32>
    %109 = arith.mulf %24, %106 : vector<8x70xf32>
    %110 = arith.addf %104, %109 : vector<8x70xf32>
    %111 = math.tanh %108 : vector<8x70xf32>
    %112 = math.tanh %110 : vector<8x70xf32>
    %113 = arith.mulf %27, %111 : vector<8x70xf32>
    %114 = arith.addf %39, %113 : vector<8x70xf32>
    %115 = arith.mulf %30, %112 : vector<8x70xf32>
    %116 = arith.addf %114, %115 : vector<8x70xf32>
    %117 = arith.mulf %33, %111 : vector<8x70xf32>
    %118 = arith.addf %42, %117 : vector<8x70xf32>
    %119 = arith.mulf %36, %112 : vector<8x70xf32>
    %120 = arith.addf %118, %119 : vector<8x70xf32>
    %c8 = arith.constant 8 : index
    %c0_19 = arith.constant 0 : index
    %c0_20 = arith.constant 0 : index
    %121 = vector.load %arg2[%c8, %c0_19, %c0_20] : memref<24x8x70xf32, #tpu.memory_space<vmem>>, vector<1x8x70xf32>
    %122 = vector.shape_cast %121 : vector<1x8x70xf32> to vector<8x70xf32>
    %123 = arith.mulf %3, %122 : vector<8x70xf32>
    %124 = arith.addf %116, %123 : vector<8x70xf32>
    %125 = arith.mulf %15, %122 : vector<8x70xf32>
    %126 = arith.addf %120, %125 : vector<8x70xf32>
    %c9 = arith.constant 9 : index
    %c0_21 = arith.constant 0 : index
    %c0_22 = arith.constant 0 : index
    %127 = vector.load %arg2[%c9, %c0_21, %c0_22] : memref<24x8x70xf32, #tpu.memory_space<vmem>>, vector<1x8x70xf32>
    %128 = vector.shape_cast %127 : vector<1x8x70xf32> to vector<8x70xf32>
    %129 = arith.mulf %6, %128 : vector<8x70xf32>
    %130 = arith.addf %124, %129 : vector<8x70xf32>
    %131 = arith.mulf %18, %128 : vector<8x70xf32>
    %132 = arith.addf %126, %131 : vector<8x70xf32>
    %c10 = arith.constant 10 : index
    %c0_23 = arith.constant 0 : index
    %c0_24 = arith.constant 0 : index
    %133 = vector.load %arg2[%c10, %c0_23, %c0_24] : memref<24x8x70xf32, #tpu.memory_space<vmem>>, vector<1x8x70xf32>
    %134 = vector.shape_cast %133 : vector<1x8x70xf32> to vector<8x70xf32>
    %135 = arith.mulf %9, %134 : vector<8x70xf32>
    %136 = arith.addf %130, %135 : vector<8x70xf32>
    %137 = arith.mulf %21, %134 : vector<8x70xf32>
    %138 = arith.addf %132, %137 : vector<8x70xf32>
    %c11 = arith.constant 11 : index
    %c0_25 = arith.constant 0 : index
    %c0_26 = arith.constant 0 : index
    %139 = vector.load %arg2[%c11, %c0_25, %c0_26] : memref<24x8x70xf32, #tpu.memory_space<vmem>>, vector<1x8x70xf32>
    %140 = vector.shape_cast %139 : vector<1x8x70xf32> to vector<8x70xf32>
    %141 = arith.mulf %12, %140 : vector<8x70xf32>
    %142 = arith.addf %136, %141 : vector<8x70xf32>
    %143 = arith.mulf %24, %140 : vector<8x70xf32>
    %144 = arith.addf %138, %143 : vector<8x70xf32>
    %145 = math.tanh %142 : vector<8x70xf32>
    %146 = math.tanh %144 : vector<8x70xf32>
    %147 = arith.mulf %27, %145 : vector<8x70xf32>
    %148 = arith.addf %39, %147 : vector<8x70xf32>
    %149 = arith.mulf %30, %146 : vector<8x70xf32>
    %150 = arith.addf %148, %149 : vector<8x70xf32>
    %151 = arith.mulf %33, %145 : vector<8x70xf32>
    %152 = arith.addf %42, %151 : vector<8x70xf32>
    %153 = arith.mulf %36, %146 : vector<8x70xf32>
    %154 = arith.addf %152, %153 : vector<8x70xf32>
    %c12 = arith.constant 12 : index
    %c0_27 = arith.constant 0 : index
    %c0_28 = arith.constant 0 : index
    %155 = vector.load %arg2[%c12, %c0_27, %c0_28] : memref<24x8x70xf32, #tpu.memory_space<vmem>>, vector<1x8x70xf32>
    %156 = vector.shape_cast %155 : vector<1x8x70xf32> to vector<8x70xf32>
    %157 = arith.mulf %3, %156 : vector<8x70xf32>
    %158 = arith.addf %150, %157 : vector<8x70xf32>
    %159 = arith.mulf %15, %156 : vector<8x70xf32>
    %160 = arith.addf %154, %159 : vector<8x70xf32>
    %c13 = arith.constant 13 : index
    %c0_29 = arith.constant 0 : index
    %c0_30 = arith.constant 0 : index
    %161 = vector.load %arg2[%c13, %c0_29, %c0_30] : memref<24x8x70xf32, #tpu.memory_space<vmem>>, vector<1x8x70xf32>
    %162 = vector.shape_cast %161 : vector<1x8x70xf32> to vector<8x70xf32>
    %163 = arith.mulf %6, %162 : vector<8x70xf32>
    %164 = arith.addf %158, %163 : vector<8x70xf32>
    %165 = arith.mulf %18, %162 : vector<8x70xf32>
    %166 = arith.addf %160, %165 : vector<8x70xf32>
    %c14 = arith.constant 14 : index
    %c0_31 = arith.constant 0 : index
    %c0_32 = arith.constant 0 : index
    %167 = vector.load %arg2[%c14, %c0_31, %c0_32] : memref<24x8x70xf32, #tpu.memory_space<vmem>>, vector<1x8x70xf32>
    %168 = vector.shape_cast %167 : vector<1x8x70xf32> to vector<8x70xf32>
    %169 = arith.mulf %9, %168 : vector<8x70xf32>
    %170 = arith.addf %164, %169 : vector<8x70xf32>
    %171 = arith.mulf %21, %168 : vector<8x70xf32>
    %172 = arith.addf %166, %171 : vector<8x70xf32>
    %c15 = arith.constant 15 : index
    %c0_33 = arith.constant 0 : index
    %c0_34 = arith.constant 0 : index
    %173 = vector.load %arg2[%c15, %c0_33, %c0_34] : memref<24x8x70xf32, #tpu.memory_space<vmem>>, vector<1x8x70xf32>
    %174 = vector.shape_cast %173 : vector<1x8x70xf32> to vector<8x70xf32>
    %175 = arith.mulf %12, %174 : vector<8x70xf32>
    %176 = arith.addf %170, %175 : vector<8x70xf32>
    %177 = arith.mulf %24, %174 : vector<8x70xf32>
    %178 = arith.addf %172, %177 : vector<8x70xf32>
    %179 = math.tanh %176 : vector<8x70xf32>
    %180 = math.tanh %178 : vector<8x70xf32>
    %181 = arith.mulf %27, %179 : vector<8x70xf32>
    %182 = arith.addf %39, %181 : vector<8x70xf32>
    %183 = arith.mulf %30, %180 : vector<8x70xf32>
    %184 = arith.addf %182, %183 : vector<8x70xf32>
    %185 = arith.mulf %33, %179 : vector<8x70xf32>
    %186 = arith.addf %42, %185 : vector<8x70xf32>
    %187 = arith.mulf %36, %180 : vector<8x70xf32>
    %188 = arith.addf %186, %187 : vector<8x70xf32>
    %c16 = arith.constant 16 : index
    %c0_35 = arith.constant 0 : index
    %c0_36 = arith.constant 0 : index
    %189 = vector.load %arg2[%c16, %c0_35, %c0_36] : memref<24x8x70xf32, #tpu.memory_space<vmem>>, vector<1x8x70xf32>
    %190 = vector.shape_cast %189 : vector<1x8x70xf32> to vector<8x70xf32>
    %191 = arith.mulf %3, %190 : vector<8x70xf32>
    %192 = arith.addf %184, %191 : vector<8x70xf32>
    %193 = arith.mulf %15, %190 : vector<8x70xf32>
    %194 = arith.addf %188, %193 : vector<8x70xf32>
    %c17 = arith.constant 17 : index
    %c0_37 = arith.constant 0 : index
    %c0_38 = arith.constant 0 : index
    %195 = vector.load %arg2[%c17, %c0_37, %c0_38] : memref<24x8x70xf32, #tpu.memory_space<vmem>>, vector<1x8x70xf32>
    %196 = vector.shape_cast %195 : vector<1x8x70xf32> to vector<8x70xf32>
    %197 = arith.mulf %6, %196 : vector<8x70xf32>
    %198 = arith.addf %192, %197 : vector<8x70xf32>
    %199 = arith.mulf %18, %196 : vector<8x70xf32>
    %200 = arith.addf %194, %199 : vector<8x70xf32>
    %c18 = arith.constant 18 : index
    %c0_39 = arith.constant 0 : index
    %c0_40 = arith.constant 0 : index
    %201 = vector.load %arg2[%c18, %c0_39, %c0_40] : memref<24x8x70xf32, #tpu.memory_space<vmem>>, vector<1x8x70xf32>
    %202 = vector.shape_cast %201 : vector<1x8x70xf32> to vector<8x70xf32>
    %203 = arith.mulf %9, %202 : vector<8x70xf32>
    %204 = arith.addf %198, %203 : vector<8x70xf32>
    %205 = arith.mulf %21, %202 : vector<8x70xf32>
    %206 = arith.addf %200, %205 : vector<8x70xf32>
    %c19 = arith.constant 19 : index
    %c0_41 = arith.constant 0 : index
    %c0_42 = arith.constant 0 : index
    %207 = vector.load %arg2[%c19, %c0_41, %c0_42] : memref<24x8x70xf32, #tpu.memory_space<vmem>>, vector<1x8x70xf32>
    %208 = vector.shape_cast %207 : vector<1x8x70xf32> to vector<8x70xf32>
    %209 = arith.mulf %12, %208 : vector<8x70xf32>
    %210 = arith.addf %204, %209 : vector<8x70xf32>
    %211 = arith.mulf %24, %208 : vector<8x70xf32>
    %212 = arith.addf %206, %211 : vector<8x70xf32>
    %213 = math.tanh %210 : vector<8x70xf32>
    %214 = math.tanh %212 : vector<8x70xf32>
    %215 = arith.mulf %27, %213 : vector<8x70xf32>
    %216 = arith.addf %39, %215 : vector<8x70xf32>
    %217 = arith.mulf %30, %214 : vector<8x70xf32>
    %218 = arith.addf %216, %217 : vector<8x70xf32>
    %219 = arith.mulf %33, %213 : vector<8x70xf32>
    %220 = arith.addf %42, %219 : vector<8x70xf32>
    %221 = arith.mulf %36, %214 : vector<8x70xf32>
    %222 = arith.addf %220, %221 : vector<8x70xf32>
    %c20 = arith.constant 20 : index
    %c0_43 = arith.constant 0 : index
    %c0_44 = arith.constant 0 : index
    %223 = vector.load %arg2[%c20, %c0_43, %c0_44] : memref<24x8x70xf32, #tpu.memory_space<vmem>>, vector<1x8x70xf32>
    %224 = vector.shape_cast %223 : vector<1x8x70xf32> to vector<8x70xf32>
    %225 = arith.mulf %3, %224 : vector<8x70xf32>
    %226 = arith.addf %218, %225 : vector<8x70xf32>
    %227 = arith.mulf %15, %224 : vector<8x70xf32>
    %228 = arith.addf %222, %227 : vector<8x70xf32>
    %c21 = arith.constant 21 : index
    %c0_45 = arith.constant 0 : index
    %c0_46 = arith.constant 0 : index
    %229 = vector.load %arg2[%c21, %c0_45, %c0_46] : memref<24x8x70xf32, #tpu.memory_space<vmem>>, vector<1x8x70xf32>
    %230 = vector.shape_cast %229 : vector<1x8x70xf32> to vector<8x70xf32>
    %231 = arith.mulf %6, %230 : vector<8x70xf32>
    %232 = arith.addf %226, %231 : vector<8x70xf32>
    %233 = arith.mulf %18, %230 : vector<8x70xf32>
    %234 = arith.addf %228, %233 : vector<8x70xf32>
    %c22 = arith.constant 22 : index
    %c0_47 = arith.constant 0 : index
    %c0_48 = arith.constant 0 : index
    %235 = vector.load %arg2[%c22, %c0_47, %c0_48] : memref<24x8x70xf32, #tpu.memory_space<vmem>>, vector<1x8x70xf32>
    %236 = vector.shape_cast %235 : vector<1x8x70xf32> to vector<8x70xf32>
    %237 = arith.mulf %9, %236 : vector<8x70xf32>
    %238 = arith.addf %232, %237 : vector<8x70xf32>
    %239 = arith.mulf %21, %236 : vector<8x70xf32>
    %240 = arith.addf %234, %239 : vector<8x70xf32>
    %c23 = arith.constant 23 : index
    %c0_49 = arith.constant 0 : index
    %c0_50 = arith.constant 0 : index
    %241 = vector.load %arg2[%c23, %c0_49, %c0_50] : memref<24x8x70xf32, #tpu.memory_space<vmem>>, vector<1x8x70xf32>
    %242 = vector.shape_cast %241 : vector<1x8x70xf32> to vector<8x70xf32>
    %243 = arith.mulf %12, %242 : vector<8x70xf32>
    %244 = arith.addf %238, %243 : vector<8x70xf32>
    %245 = arith.mulf %24, %242 : vector<8x70xf32>
    %246 = arith.addf %240, %245 : vector<8x70xf32>
    %247 = math.tanh %244 : vector<8x70xf32>
    %248 = math.tanh %246 : vector<8x70xf32>
    %c0_51 = arith.constant 0 : index
    %c0_52 = arith.constant 0 : index
    %249 = vector.load %arg1[%c0_51, %c0_52] : memref<8x70xf32, #tpu.memory_space<vmem>>, vector<8x70xf32>
    %250 = vector.extract_strided_slice %247 {offsets = [0, 0], sizes = [2, 70], strides = [1, 1]} : vector<8x70xf32> to vector<2x70xf32>
    %251 = vector.extract_strided_slice %247 {offsets = [2, 0], sizes = [2, 70], strides = [1, 1]} : vector<8x70xf32> to vector<2x70xf32>
    %252 = arith.subf %250, %251 : vector<2x70xf32>
    %253 = math.absf %252 : vector<2x70xf32>
    %254 = vector.extract_strided_slice %248 {offsets = [0, 0], sizes = [2, 70], strides = [1, 1]} : vector<8x70xf32> to vector<2x70xf32>
    %255 = vector.extract_strided_slice %248 {offsets = [2, 0], sizes = [2, 70], strides = [1, 1]} : vector<8x70xf32> to vector<2x70xf32>
    %256 = arith.subf %254, %255 : vector<2x70xf32>
    %257 = math.absf %256 : vector<2x70xf32>
    %258 = vector.extract_strided_slice %247 {offsets = [4, 0], sizes = [2, 70], strides = [1, 1]} : vector<8x70xf32> to vector<2x70xf32>
    %259 = vector.extract_strided_slice %247 {offsets = [6, 0], sizes = [2, 70], strides = [1, 1]} : vector<8x70xf32> to vector<2x70xf32>
    %260 = arith.subf %258, %259 : vector<2x70xf32>
    %261 = math.absf %260 : vector<2x70xf32>
    %262 = vector.extract_strided_slice %248 {offsets = [4, 0], sizes = [2, 70], strides = [1, 1]} : vector<8x70xf32> to vector<2x70xf32>
    %263 = vector.extract_strided_slice %248 {offsets = [6, 0], sizes = [2, 70], strides = [1, 1]} : vector<8x70xf32> to vector<2x70xf32>
    %264 = arith.subf %262, %263 : vector<2x70xf32>
    %265 = math.absf %264 : vector<2x70xf32>
    %266 = vector.extract_strided_slice %249 {offsets = [0, 0], sizes = [1, 70], strides = [1, 1]} : vector<8x70xf32> to vector<1x70xf32>
    %267 = vector.broadcast %266 : vector<1x70xf32> to vector<2x70xf32>
    %268 = arith.mulf %253, %267 : vector<2x70xf32>
    %269 = vector.extract_strided_slice %249 {offsets = [1, 0], sizes = [1, 70], strides = [1, 1]} : vector<8x70xf32> to vector<1x70xf32>
    %270 = vector.broadcast %269 : vector<1x70xf32> to vector<2x70xf32>
    %271 = arith.mulf %257, %270 : vector<2x70xf32>
    %272 = arith.addf %268, %271 : vector<2x70xf32>
    %273 = vector.extract_strided_slice %249 {offsets = [2, 0], sizes = [1, 70], strides = [1, 1]} : vector<8x70xf32> to vector<1x70xf32>
    %274 = vector.broadcast %273 : vector<1x70xf32> to vector<2x70xf32>
    %275 = arith.mulf %261, %274 : vector<2x70xf32>
    %276 = arith.addf %272, %275 : vector<2x70xf32>
    %277 = vector.extract_strided_slice %249 {offsets = [3, 0], sizes = [1, 70], strides = [1, 1]} : vector<8x70xf32> to vector<1x70xf32>
    %278 = vector.broadcast %277 : vector<1x70xf32> to vector<2x70xf32>
    %279 = arith.mulf %265, %278 : vector<2x70xf32>
    %280 = arith.addf %276, %279 : vector<2x70xf32>
    %cst_53 = arith.constant dense<0.000000e+00> : vector<2xf32>
    %281 = vector.multi_reduction <add>, %280, %cst_53 [1] : vector<2x70xf32> to vector<2xf32>
    %282 = vector.shape_cast %281 : vector<2xf32> to vector<2x1xf32>
    %c0_54 = arith.constant 0 : index
    %c0_55 = arith.constant 0 : index
    %283 = vector.load %arg3[%c0_54, %c0_55] : memref<4x5xf32, #tpu.memory_space<vmem>>, vector<4x5xf32>
    %284 = vector.extract_strided_slice %283 {offsets = [0, 0], sizes = [2, 5], strides = [1, 1]} : vector<4x5xf32> to vector<2x5xf32>
    %285 = vector.extract_strided_slice %283 {offsets = [2, 0], sizes = [2, 5], strides = [1, 1]} : vector<4x5xf32> to vector<2x5xf32>
    %286 = arith.subf %284, %285 : vector<2x5xf32>
    %287 = math.absf %286 : vector<2x5xf32>
    %288 = vector.extract_strided_slice %249 {offsets = [4, 0], sizes = [1, 5], strides = [1, 1]} : vector<8x70xf32> to vector<1x5xf32>
    %289 = vector.broadcast %288 : vector<1x5xf32> to vector<2x5xf32>
    %290 = arith.mulf %287, %289 : vector<2x5xf32>
    %cst_56 = arith.constant dense<0.000000e+00> : vector<2xf32>
    %291 = vector.multi_reduction <add>, %290, %cst_56 [1] : vector<2x5xf32> to vector<2xf32>
    %292 = vector.shape_cast %291 : vector<2xf32> to vector<2x1xf32>
    %293 = arith.addf %282, %292 : vector<2x1xf32>
    %294 = vector.extract_strided_slice %249 {offsets = [5, 0], sizes = [1, 1], strides = [1, 1]} : vector<8x70xf32> to vector<1x1xf32>
    %295 = vector.broadcast %294 : vector<1x1xf32> to vector<2x1xf32>
    %296 = arith.addf %293, %295 : vector<2x1xf32>
    %297 = math.exp %296 : vector<2x1xf32>
    %cst_57 = arith.constant 1.000000e+00 : f32
    %298 = vector.broadcast %cst_57 : f32 to vector<2x1xf32>
    %299 = arith.addf %298, %297 : vector<2x1xf32>
    %cst_58 = arith.constant 1.000000e+00 : f32
    %300 = vector.broadcast %cst_58 : f32 to vector<2x1xf32>
    %301 = arith.divf %300, %299 : vector<2x1xf32>
    %c0_59 = arith.constant 0 : index
    %c0_60 = arith.constant 0 : index
    %302 = vector.load %arg4[%c0_59, %c0_60] : memref<2x1xf32, #tpu.memory_space<vmem>>, vector<2x1xf32>
    tpu.vector_store %arg4[%c0_59, %c0_60], %301 {strides = array<i32>} : memref<2x1xf32, #tpu.memory_space<vmem>>, vector<2x1xf32>,
    return
  }
}

</mosaic_0001>

<bundles_post_ra>
// kernel: net_forward.1
= control target key start
LH: loop header
LB: loop body
LE: loop exit
PB: predicated region body
PF: predicated region fallthrough
CT: control target
= control target key end

     0   :  { %v434_v0 = vmov 10   ;;  %v435_v1 = vmov 8   ;;  %v436_v3 = vmov 12   ;;  %v437_v4 = vmov 9   ;;  %s738_s0 = inlined_call_operand.vmem [shape: f32[8,14], index: 0, kind: input, shape index: {}]   ;;  %s739_s2 = inlined_call_operand.vmem [shape: f32[24,8,70], index: 2, kind: input, shape index: {}]   ;;  %s740_s3 = inlined_call_operand.vmem [shape: f32[4,5], index: 3, kind: input, shape index: {}]   ;;  %s741_s1 = inlined_call_operand.vmem [shape: f32[8,70], index: 1, kind: input, shape index: {}]   ;;  %s742_s4 = inlined_call_operand.vmem [shape: f32[2,1], index: 4, kind: output, shape index: {}]  }
   0x1   :  { %393 = vset.pattern.permute.xlu1 %v434_v0  ;;  %391 = vset.pattern.permute.xlu0 %v435_v1  ;;  %v17_v2 = vld [vmem:[%s738_s0] sm:$0xff]  ;;  %v438_v5 = vmov 0   ;;  %v439_v6 = vmov 11   ;;  %v440_v7 = vmov 13   ;;  %v441_v8 = vmov 4   ;;  %v366_v33 = vld [vmem:[%s739_s2 + $0x68] sm:$0xff] }
   0x2   :  { %60 = vperm.xlu1 %393, %v17_v2   ;;  %52 = vperm.xlu0 %391, %v17_v2   ;;  %v442_v9 = vmov 1   ;;  %v443_v10 = vmov 3   ;;  %v444_v11 = vmov 2   ;;  %v445_v12 = vmov 5   ;;  %v365_v19 = vld [vmem:[%s739_s2 + $0x60] sm:$0xff]  ;;  %v370_v35 = vld [vmem:[%s739_s2 + $0x88] sm:$0xff] }
   0x3   :  { %v446_v13 = vmov 6   ;;  %v447_v14 = vmov 7   ;;  %v369_v20 = vld [vmem:[%s739_s2 + $0x80] sm:$0xff]  ;;  %v374_v36 = vld [vmem:[%s739_s2 + $0xa8] sm:$0xff]  ;;  %v355_v45 = vld [vmem:[%s739_s2 + $0x10] sm:$0xff]  ;;  %vm333_vm0 = vcmask 33792  }
   0x4   :  { %v373_v21 = vld [vmem:[%s739_s2 + $0xa0] sm:$0xff]  ;;  %v354_v40 = vld [vmem:[%s739_s2 + $0x8] sm:$0xff]  ;;  %v367_v46 = vld [vmem:[%s739_s2 + $0x70] sm:$0xff]  ;;  %vm318_vm1 = vcmask 566272   ;;  %vm348_vm2 = vcmask 1024  }
   0x5   :  { %v83_v34 = vld [vmem:[%s739_s2] sm:$0xff]  ;;  %v371_v49 = vld [vmem:[%s739_s2 + $0x90] sm:$0xff]  ;;  %v356_v58 = vld [vmem:[%s739_s2 + $0x18] sm:$0xff] }
   0x6   :  { %394 = vset.pattern.permute.xlu1 %v436_v3  ;;  %392 = vset.pattern.permute.xlu0 %v437_v4  ;;  %v375_v50 = vld [vmem:[%s739_s2 + $0xb0] sm:$0xff] }
   0x7   :  { %68 = vperm.xlu1 %394, %v17_v2   ;;  %56 = vperm.xlu0 %392, %v17_v2  }
   0xb   :  { %395 = vset.pattern.permute.xlu1 %v438_v5  ;;  %396 = vset.pattern.permute.xlu0 %v439_v6 }
   0xc   :  { %20 = vperm.xlu1 %395, %v17_v2   ;;  %64 = vperm.xlu0 %396, %v17_v2  }
  0x10   :  { %397 = vset.pattern.permute.xlu1 %v440_v7  ;;  %399 = vset.pattern.permute.xlu0 %v441_v8 }
  0x11   :  { %72 = vperm.xlu1 %397, %v17_v2   ;;  %36 = vperm.xlu0 %399, %v17_v2  }
  0x15   :  { %398 = vset.pattern.permute.xlu1 %v442_v9  ;;  %402 = vset.pattern.permute.xlu0 %v443_v10 }
  0x16   :  { %24 = vperm.xlu1 %398, %v17_v2   ;;  %32 = vperm.xlu0 %402, %v17_v2  }
  0x1a   :  { %400 = vset.pattern.permute.xlu1 %v444_v11  ;;  %405 = vset.pattern.permute.xlu0 %v440_v7 }
  0x1b   :  { %28 = vperm.xlu1 %400, %v17_v2  }
  0x1f   :  { %401 = vset.pattern.permute.xlu1 %v445_v12 }
  0x20   :  { %40 = vperm.xlu1 %401, %v17_v2  }
  0x24   :  { %403 = vset.pattern.permute.xlu1 %v446_v13 }
  0x25   :  { %44 = vperm.xlu1 %403, %v17_v2  }
  0x29   :  { %404 = vset.pattern.permute.xlu1 %v447_v14 }
  0x2a   :  { %48 = vperm.xlu1 %404, %v17_v2  }
  0x7d   :  { %v476_v15 = vpop.permute.xlu1 %60  ;;  %v478_v16 = vpop.permute.xlu0 %52 }
  0x7e   :  { %v75_v28 = vmul.f32 0.0, %v478_v16  ;;  %v79_v55 = vmul.f32 0.0, %v476_v15 }
  0x82   :  { %v480_v17 = vpop.permute.xlu1 %68  ;;  %v482_v18 = vpop.permute.xlu0 %56 }
  0x83   :  { %v76_v37 = vadd.f32 %v75_v28, %v480_v17  ;;  %v77_v38 = vmul.f32 0.0, %v482_v18 }
  0x85   :  { %v78_v47 = vadd.f32 %v77_v38, %v76_v37  ;;  %v289_v37 = vlaneseq  ;;  %v322_v38 = vld [vmem:[%s740_s3] sm:$0xf] }
  0x87   :  { %v493_v22 = vpop.permute.xlu1 %20  ;;  %v495_v23 = vpop.permute.xlu0 %64 }
  0x88   :  { %v498_v24 = vmul.f32 %v365_v19, %v493_v22  ;;  %v501_v25 = vmul.f32 %v369_v20, %v493_v22  ;;  %v504_v26 = vmul.f32 %v373_v21, %v493_v22  ;;  %v84_v42 = vmul.f32 %v83_v34, %v493_v22 }
  0x89   :  { %v81_v61 = vmul.f32 0.0, %v495_v23 }
  0x8a   :  { %v85_v52 = vadd.f32 %v84_v42, %v78_v47  ;;  %v290_v42 = vshrl.u32 %v289_v37, 7 }
  0x8c   :  { %v506_v27 = vpop.permute.xlu1 %72  ;;  %v509_v29 = vpop.permute.xlu0 %36 }
  0x8d   :  { %v512_v30 = vmul.f32 %v365_v19, %v509_v29  ;;  %v515_v31 = vmul.f32 %v369_v20, %v509_v29  ;;  %v518_v32 = vmul.f32 %v373_v21, %v509_v29  ;;  %v80_v62 = vadd.f32 %v79_v55, %v506_v27 }
  0x8e   :  { %v86_v6 = vmul.f32 %v83_v34, %v509_v29  ;;  %v330_v55 = vsub.s32 4, %v290_v42 }
  0x8f   :  { %v82_v5 = vadd.f32 %v81_v61, %v80_v62  ;;  %v278_v61 = vld [vmem:[%s741_s1] sm:$0xff]  ;;  %v359_v62 = vld [vmem:[%s739_s2 + $0x30] sm:$0xff] }
  0x91   :  { %v534_v39 = vpop.permute.xlu1 %24  ;;  %v578_v59 = vpop.permute.xlu0 %32  ;;  %v87_v11 = vadd.f32 %v86_v6, %v82_v5  ;;  %v331_v6 = vrot.slane %v278_v61, %v330_v55 }
  0x92   :  { %v540_v41 = vmul.f32 %v366_v33, %v534_v39  ;;  %v544_v43 = vmul.f32 %v370_v35, %v534_v39  ;;  %v547_v44 = vmul.f32 %v374_v36, %v534_v39  ;;  %v90_v48 = vmul.f32 %v354_v40, %v534_v39 }
  0x93   :  { %v102_v0 = vmul.f32 %v356_v58, %v578_v59 }
  0x94   :  { %v91_v60 = vadd.f32 %v90_v48, %v85_v52 }
  0x96   :  { %v562_v51 = vpop.permute.xlu1 %28 }
  0x97   :  { %v96_v53 = vmul.f32 %v355_v45, %v562_v51  ;;  %v566_v54 = vmul.f32 %v367_v46, %v562_v51  ;;  %v570_v56 = vmul.f32 %v371_v49, %v562_v51  ;;  %v573_v57 = vmul.f32 %v375_v50, %v562_v51 }
  0x99   :  { %v97_v63 = vadd.f32 %v96_v53, %v91_v60 }
  0x9b   :  { %v583_v1 = vpop.permute.xlu1 %40  ;;  %v103_v7 = vadd.f32 %v102_v0, %v97_v63 }
  0x9c   :  { %v586_v2 = vmul.f32 %v366_v33, %v583_v1  ;;  %v589_v3 = vmul.f32 %v370_v35, %v583_v1  ;;  %v592_v4 = vmul.f32 %v374_v36, %v583_v1  ;;  %v92_v8 = vmul.f32 %v354_v40, %v583_v1  ;;  %v357_v40 = vld [vmem:[%s739_s2 + $0x20] sm:$0xff] }
  0x9d   :  { %406 = vtanh.f32 %v103_v7  ;;  %v120_v60 = vmul.f32 %v357_v40, %v509_v29 }
  0x9e   :  { %v93_v19 = vadd.f32 %v92_v8, %v87_v11 }
  0xa0   :  { %v596_v9 = vpop.permute.xlu1 %44 }
  0xa1   :  { %v599_v10 = vmul.f32 %v367_v46, %v596_v9  ;;  %v98_v12 = vmul.f32 %v355_v45, %v596_v9  ;;  %v603_v13 = vmul.f32 %v371_v49, %v596_v9  ;;  %v606_v14 = vmul.f32 %v375_v50, %v596_v9  ;;  %v358_v49 = vld [vmem:[%s739_s2 + $0x28] sm:$0xff] }
  0xa2   :  { %v324_v45 = vrot.slane %v322_v38, 2  ;;  %v124_v7 = vmul.f32 %v358_v49, %v534_v39  ;;  %v126_v8 = vmul.f32 %v358_v49, %v583_v1  ;;  %v296_v49 = vsub.s32 1, %v290_v42 }
  0xa3   :  { %v99_v21 = vadd.f32 %v98_v12, %v93_v19 }
  0xa4   :  { %v326_v53 = vsub.f32 %v322_v38, %v324_v45  ;;  %v645_v55 = vrot.slane %v278_v61, %v296_v49 }
  0xa5   :  { %v608_v20 = vpop.permute.xlu1 %48 }
  0xa6   :  { %v104_v28 = vmul.f32 %v356_v58, %v608_v20  ;;  %v118_v58 = vmul.f32 %v357_v40, %v493_v22  ;;  %v327_v5 = vand.u32 2147483647, %v326_v53 }
  0xa8   :  { %v105_v33 = vadd.f32 %v104_v28, %v99_v21  ;;  %v332_v19 = vmul.f32 %v331_v6, %v327_v5  ;;  %v130_v21 = vmul.f32 %v359_v62, %v562_v51  ;;  %v360_v28 = vld [vmem:[%s739_s2 + $0x38] sm:$0xff]  ;;  %v340_v6 = vsub.s32 5, %v290_v42 }
  0xa9   :  { %v136_v37 = vmul.f32 %v360_v28, %v578_v59  ;;  %v138_v45 = vmul.f32 %v360_v28, %v608_v20  ;;  %v362_v28 = vld [vmem:[%s739_s2 + $0x48] sm:$0xff] }
  0xaa   :  { %408 = vtanh.f32 %v105_v33  ;;  %v407_v34 = vpop.eup %406  ;;  %v132_v33 = vmul.f32 %v359_v62, %v596_v9 }
  0xab   :  { %v108_v35 = vmul.f32 %v407_v34, %v478_v16  ;;  %v112_v36 = vmul.f32 %v407_v34, %v476_v15 }
  0xad   :  { %v109_v47 = vadd.f32 %v108_v35, %v480_v17  ;;  %v113_v48 = vadd.f32 %v112_v36, %v506_v27  ;;  %v334_v36 = vsel %vm333_vm0, %v332_v19, 0.0 }
  0xae   :  { %335 = vadd.xlane.f32.xlu1 %v334_v36  ;;  %v363_v36 = vld [vmem:[%s739_s2 + $0x50] sm:$0xff] }
  0xb7   :  { %v409_v46 = vpop.eup %408 }
  0xb8   :  { %v110_v50 = vmul.f32 %v409_v46, %v482_v18  ;;  %v114_v52 = vmul.f32 %v409_v46, %v495_v23 }
  0xba   :  { %v111_v63 = vadd.f32 %v110_v50, %v109_v47  ;;  %v115_v0 = vadd.f32 %v114_v52, %v113_v48  ;;  %v291_v48 = vsub.s32 0, %v290_v42  ;;  %v302_v50 = vsub.s32 2, %v290_v42 }
  0xbb   :  { %v311_v52 = vsub.s32 3, %v290_v42 }
  0xbc   :  { %v119_v11 = vadd.f32 %v118_v58, %v111_v63  ;;  %v121_v12 = vadd.f32 %v120_v60, %v115_v0  ;;  %v643_v53 = vrot.slane %v278_v61, %v291_v48  ;;  %v647_v58 = vrot.slane %v278_v61, %v302_v50 }
  0xbd   :  { %v649_v60 = vrot.slane %v278_v61, %v311_v52 }
  0xbe   :  { %v125_v34 = vadd.f32 %v124_v7, %v119_v11  ;;  %v127_v35 = vadd.f32 %v126_v8, %v121_v12  ;;  %v361_v7 = vld [vmem:[%s739_s2 + $0x40] sm:$0xff] }
  0xbf   :  { %v152_v42 = vmul.f32 %v361_v7, %v493_v22  ;;  %v164_v22 = vmul.f32 %v363_v36, %v562_v51 }
  0xc0   :  { %v131_v38 = vadd.f32 %v130_v21, %v125_v34  ;;  %v133_v40 = vadd.f32 %v132_v33, %v127_v35  ;;  %v660_v21 = vrot.slane %v278_v61, %v340_v6  ;;  %v154_v33 = vmul.f32 %v361_v7, %v509_v29 }
  0xc1   :  { %v166_v29 = vmul.f32 %v363_v36, %v596_v9 }
  0xc2   :  { %v137_v46 = vadd.f32 %v136_v37, %v131_v38  ;;  %v139_v47 = vadd.f32 %v138_v45, %v133_v40  ;;  %v158_v37 = vmul.f32 %v362_v28, %v534_v39  ;;  %v160_v38 = vmul.f32 %v362_v28, %v583_v1  ;;  %v364_v45 = vld [vmem:[%s739_s2 + $0x58] sm:$0xff] }
  0xc3   :  { %v170_v48 = vmul.f32 %v364_v45, %v578_v59  ;;  %v172_v39 = vmul.f32 %v364_v45, %v608_v20  ;;  %v368_v28 = vld [vmem:[%s739_s2 + $0x78] sm:$0xff] }
  0xc4   :  { %410 = vtanh.f32 %v137_v46 }
  0xc5   :  { %412 = vtanh.f32 %v139_v47 }
  0xd1   :  { %v411_v62 = vpop.eup %410 }
  0xd2   :  { %v413_v63 = vpop.eup %412  ;;  %v142_v0 = vmul.f32 %v411_v62, %v478_v16  ;;  %v146_v5 = vmul.f32 %v411_v62, %v476_v15 }
  0xd3   :  { %v144_v8 = vmul.f32 %v413_v63, %v482_v18  ;;  %v148_v19 = vmul.f32 %v413_v63, %v495_v23 }
  0xd4   :  { %v143_v11 = vadd.f32 %v142_v0, %v480_v17  ;;  %v147_v12 = vadd.f32 %v146_v5, %v506_v27 }
  0xd6   :  { %v145_v34 = vadd.f32 %v144_v8, %v143_v11  ;;  %v149_v35 = vadd.f32 %v148_v19, %v147_v12 }
  0xd8   :  { %v153_v61 = vadd.f32 %v152_v42, %v145_v34  ;;  %v155_v40 = vadd.f32 %v154_v33, %v149_v35  ;;  %v204_v34 = vmul.f32 %v368_v28, %v578_v59 }
  0xda   :  { %v159_v46 = vadd.f32 %v158_v37, %v153_v61  ;;  %v161_v47 = vadd.f32 %v160_v38, %v155_v40  ;;  %v206_v37 = vmul.f32 %v368_v28, %v608_v20 }
  0xdc   :  { %v165_v49 = vadd.f32 %v164_v22, %v159_v46  ;;  %v167_v50 = vadd.f32 %v166_v29, %v161_v47 }
  0xde   :  { %v171_v52 = vadd.f32 %v170_v48, %v165_v49  ;;  %v173_v1 = vadd.f32 %v172_v39, %v167_v50  ;;  %v372_v48 = vld [vmem:[%s739_s2 + $0x98] sm:$0xff] }
  0xdf   :  { %v238_v39 = vmul.f32 %v372_v48, %v578_v59 }
  0xe0   :  { %414 = vtanh.f32 %v171_v52 }
  0xe1   :  { %416 = vtanh.f32 %v173_v1 }
  0xed   :  { %v415_v62 = vpop.eup %414 }
  0xee   :  { %v417_v63 = vpop.eup %416  ;;  %v176_v0 = vmul.f32 %v415_v62, %v478_v16  ;;  %v180_v51 = vmul.f32 %v415_v62, %v476_v15  ;;  %v240_v62 = vmul.f32 %v372_v48, %v608_v20 }
  0xef   :  { %v178_v5 = vmul.f32 %v417_v63, %v482_v18  ;;  %v182_v7 = vmul.f32 %v417_v63, %v495_v23 }
  0xf0   :  { %v177_v9 = vadd.f32 %v176_v0, %v480_v17  ;;  %v181_v6 = vadd.f32 %v180_v51, %v506_v27 }
  0xf2   :  { %v179_v8 = vadd.f32 %v178_v5, %v177_v9  ;;  %v183_v11 = vadd.f32 %v182_v7, %v181_v6 }
  0xf4   :  { %v187_v12 = vadd.f32 %v498_v24, %v179_v8  ;;  %v189_v19 = vadd.f32 %v512_v30, %v183_v11 }
  0xf6   :  { %v193_v42 = vadd.f32 %v540_v41, %v187_v12  ;;  %v195_v33 = vadd.f32 %v586_v2, %v189_v19 }
  0xf8   :  { %v199_v35 = vadd.f32 %v566_v54, %v193_v42  ;;  %v201_v36 = vadd.f32 %v599_v10, %v195_v33 }
  0xfa   :  { %v205_v38 = vadd.f32 %v204_v34, %v199_v35  ;;  %v207_v24 = vadd.f32 %v206_v37, %v201_v36 }
  0xfc   :  { %418 = vtanh.f32 %v205_v38 }
  0xfd   :  { %420 = vtanh.f32 %v207_v24 }
 0x109   :  { %v419_v30 = vpop.eup %418 }
 0x10a   :  { %v421_v61 = vpop.eup %420  ;;  %v210_v40 = vmul.f32 %v419_v30, %v478_v16  ;;  %v214_v41 = vmul.f32 %v419_v30, %v476_v15 }
 0x10b   :  { %v212_v45 = vmul.f32 %v421_v61, %v482_v18  ;;  %v216_v10 = vmul.f32 %v421_v61, %v495_v23 }
 0x10c   :  { %v211_v2 = vadd.f32 %v210_v40, %v480_v17  ;;  %v215_v54 = vadd.f32 %v214_v41, %v506_v27 }
 0x10e   :  { %v213_v22 = vadd.f32 %v212_v45, %v211_v2  ;;  %v217_v29 = vadd.f32 %v216_v10, %v215_v54 }
 0x110   :  { %v221_v46 = vadd.f32 %v501_v25, %v213_v22  ;;  %v223_v47 = vadd.f32 %v515_v31, %v217_v29 }
 0x112   :  { %v227_v49 = vadd.f32 %v544_v43, %v221_v46  ;;  %v229_v50 = vadd.f32 %v589_v3, %v223_v47 }
 0x114   :  { %v233_v52 = vadd.f32 %v570_v56, %v227_v49  ;;  %v235_v1 = vadd.f32 %v603_v13, %v229_v50 }
 0x116   :  { %v239_v63 = vadd.f32 %v238_v39, %v233_v52  ;;  %v241_v25 = vadd.f32 %v240_v62, %v235_v1 }
 0x118   :  { %422 = vtanh.f32 %v239_v63 }
 0x119   :  { %424 = vtanh.f32 %v241_v25 }
 0x125   :  { %v423_v31 = vpop.eup %422 }
 0x126   :  { %v425_v0 = vpop.eup %424  ;;  %v244_v51 = vmul.f32 %v423_v31, %v478_v16  ;;  %v248_v43 = vmul.f32 %v423_v31, %v476_v15  ;;  %v376_v16 = vld [vmem:[%s739_s2 + $0xb8] sm:$0xff] }
 0x127   :  { %v246_v9 = vmul.f32 %v425_v0, %v482_v18  ;;  %v250_v13 = vmul.f32 %v425_v0, %v495_v23  ;;  %v272_v18 = vmul.f32 %v376_v16, %v578_v59  ;;  %v274_v23 = vmul.f32 %v376_v16, %v608_v20 }
 0x128   :  { %v245_v3 = vadd.f32 %v244_v51, %v480_v17  ;;  %v249_v56 = vadd.f32 %v248_v43, %v506_v27 }
 0x12a   :  { %v247_v5 = vadd.f32 %v246_v9, %v245_v3  ;;  %v251_v6 = vadd.f32 %v250_v13, %v249_v56 }
 0x12c   :  { %v257_v7 = vadd.f32 %v518_v32, %v251_v6  ;;  %v255_v8 = vadd.f32 %v504_v26, %v247_v5 }
 0x12e   :  { %v263_v15 = vadd.f32 %v592_v4, %v257_v7  ;;  %v261_v17 = vadd.f32 %v547_v44, %v255_v8 }
 0x130   :  { %v269_v27 = vadd.f32 %v606_v14, %v263_v15  ;;  %v267_v11 = vadd.f32 %v573_v57, %v261_v17 }
 0x132   :  { %v275_v12 = vadd.f32 %v274_v23, %v269_v27  ;;  %v273_v32 = vadd.f32 %v272_v18, %v267_v11 }
 0x134   :  { %426 = vtanh.f32 %v275_v12 }
 0x135   :  { %428 = vtanh.f32 %v273_v32 }
 0x137   :  { %v336_v61 = vpop.xlane.xlu1 %335 }
 0x141   :  { %v427_v26 = vpop.eup %426 }
 0x142   :  { %v429_v19 = vpop.eup %428  ;;  %v285_v28 = vrot.slane %v427_v26, 2 }
 0x143   :  { %v280_v42 = vrot.slane %v429_v19, 2 }
 0x144   :  { %v287_v33 = vsub.f32 %v427_v26, %v285_v28 }
 0x145   :  { %v282_v4 = vsub.f32 %v429_v19, %v280_v42 }
 0x146   :  { %v288_v34 = vand.u32 2147483647, %v287_v33 }
 0x147   :  { %v283_v44 = vand.u32 2147483647, %v282_v4 }
 0x148   :  { %v298_v59 = vmul.f32 %v645_v55, %v288_v34  ;;  %v313_v14 = vmul.f32 %v649_v60, %v288_v34 }
 0x149   :  { %v293_v20 = vmul.f32 %v643_v53, %v283_v44  ;;  %v304_v57 = vmul.f32 %v647_v58, %v283_v44 }
 0x14a   :  { %v315_v38 = vrot.slane %v313_v14, 4 }
 0x14b   :  { %v299_v35 = vadd.f32 %v298_v59, %v293_v20  ;;  %v306_v36 = vrot.slane %v304_v57, 4 }
 0x14d   :  { %v308_v37 = vadd.f32 %v306_v36, %v299_v35 }
 0x14f   :  { %v317_v24 = vadd.f32 %v315_v38, %v308_v37 }
 0x151   :  { %v319_v30 = vsel %vm318_vm1, %v317_v24, 0.0 }
 0x152   :  { %320 = vadd.xlane.f32.xlu0 %v319_v30 }
 0x1db   :  { %v321_v40 = vpop.xlane.xlu0 %320 }
 0x1dc   :  { %v337_v41 = vadd.f32 %v336_v61, %v321_v40 }
 0x1de   :  { %v342_v2 = vadd.f32 %v660_v21, %v337_v41 }
 0x1e0   :  { %v343_v55 = vmul.f32 1.442695, %v342_v2 }
 0x1e2   :  { %430 = vpow2.f32 %v343_v55 }
 0x1ef   :  { %v431_v60 = vpop.eup %430 }
 0x1f0   :  { %v345_v45 = vadd.f32 1.0, %v431_v60 }
 0x1f2   :  { %432 = vrcp.f32 %v345_v45 }
 0x1ff   :  { %v433_v53 = vpop.eup %432 }
 0x200   :  { %349 = vst.msk [vmem:[%s742_s4] sm:$0x3] %vm348_vm2, %v433_v53 }

</bundles_post_ra>
